<compile_context>
chip_gen: v6e
topology: v6e:2x2x1
jax: 0.10.0
libtpu: 0.0.40
codegen_flags: <defaults>
</compile_context>

<pallas_src>
import functools

import jax
import jax.numpy as jnp
from jax.experimental import pallas as pl
from jax.experimental.pallas import tpu as pltpu


def _round_up(n, m):
    return ((n + m - 1) // m) * m


def ffn_kernel(x_ref, w1_ref, b1_ref, w2_ref, b2_ref, o_ref, h_ref):
    # x_ref: [TM, Dp] compute dtype; w1_ref/w2_ref: [Dp, Dp] compute dtype
    # (pre-transposed so x @ w == x @ W_pt.T); b*_ref: [1, Dp] f32.
    # h_ref: [TM, Dp] f32 VMEM scratch holding the hidden activation.
    h = jnp.dot(x_ref[...], w1_ref[...], preferred_element_type=jnp.float32)
    h_ref[...] = jnp.maximum(h + b1_ref[...], 0.0)          # bias + ReLU in f32
    y = jnp.dot(h_ref[...].astype(w2_ref.dtype), w2_ref[...],
                preferred_element_type=jnp.float32)
    o_ref[...] = (y + b2_ref[...]).astype(o_ref.dtype)


@functools.partial(jax.jit, static_argnames=("compute_dtype", "tm_max"))
def ffn_forward(x, w1, b1, w2, b2, *, compute_dtype=jnp.float32, tm_max=512):
    """x: [B, S, D] float32. w1, w2: [D, D] (pre-transposed). b1, b2: [1, D].

    compute_dtype: dtype of the matmul operands (f32 or bf16); accumulation is
    always f32 and the output keeps x.dtype.
    """
    B, S, D = x.shape
    M = B * S

    # Lane-dense feature dim (multiple of 128) and sublane-aligned row tile.
    Dp = _round_up(max(D, 128), 128)
    TM = min(tm_max, _round_up(M, 8))
    Mp = _round_up(M, TM)

    cbytes = jnp.dtype(compute_dtype).itemsize

    # Zero-pad: padded columns of x/W/b are zero, so padded hidden columns are
    # relu(0) = 0 and padded output columns are 0 -> trimming is exact.
    x2d = jnp.pad(x.reshape(M, D), ((0, Mp - M), (0, Dp - D))).astype(compute_dtype)
    w1p = jnp.pad(w1, ((0, Dp - D), (0, Dp - D))).astype(compute_dtype)
    w2p = jnp.pad(w2, ((0, Dp - D), (0, Dp - D))).astype(compute_dtype)
    b1p = jnp.pad(b1, ((0, 0), (0, Dp - D))).astype(jnp.float32)
    b2p = jnp.pad(b2, ((0, 0), (0, Dp - D))).astype(jnp.float32)

    # VMEM budget: resident weights + double-buffered x/out tiles + scratch,
    # with 2x headroom, clamped to a portable range (v7x has 64 MiB VMEM/TC).
    est = (2 * Dp * Dp * cbytes          # W1, W2 (resident)
           + 2 * Dp * 4                  # biases
           + 2 * TM * Dp * cbytes        # x tile, double-buffered
           + 2 * TM * Dp * x.dtype.itemsize  # out tile, double-buffered
           + TM * Dp * 4)                # hidden scratch
    vmem_limit = int(min(max(2 * est, 32 * 1024 * 1024), 60 * 1024 * 1024))

    out2d = pl.pallas_call(
        ffn_kernel,
        out_shape=jax.ShapeDtypeStruct((Mp, Dp), x.dtype),
        grid=(Mp // TM,),
        in_specs=[
            pl.BlockSpec((TM, Dp), lambda i: (i, 0)),   # x tile (pipelined)
            pl.BlockSpec((Dp, Dp), lambda i: (0, 0)),   # W1^T (resident)
            pl.BlockSpec((1, Dp), lambda i: (0, 0)),    # b1   (resident)
            pl.BlockSpec((Dp, Dp), lambda i: (0, 0)),   # W2^T (resident)
            pl.BlockSpec((1, Dp), lambda i: (0, 0)),    # b2   (resident)
        ],
        out_specs=pl.BlockSpec((TM, Dp), lambda i: (i, 0)),
        scratch_shapes=[pltpu.VMEM((TM, Dp), jnp.float32)],
        compiler_params=pltpu.CompilerParams(
            dimension_semantics=("parallel",),          # shard M-tiles on v7x
            vmem_limit_bytes=vmem_limit),
        cost_estimate=pl.CostEstimate(
            flops=2 * 2 * Mp * Dp * Dp,
            transcendentals=0,
            bytes_accessed=(Mp * Dp * cbytes            # x
                            + 2 * Dp * Dp * cbytes      # W1, W2
                            + 2 * Dp * 4                # biases
                            + Mp * Dp * x.dtype.itemsize)),
    )(x2d, w1p, b1p, w2p, b2p)

    return out2d[:M, :D].reshape(B, S, D)


def init_ffn_params(key, d_model):
    """Deterministic init matching nn.Linear default: U(-1/sqrt(d), 1/sqrt(d))."""
    k1, k2, k3, k4 = jax.random.split(key, 4)
    bound = 1.0 / (d_model ** 0.5)
    # PyTorch Linear stores weight as [out, in]; forward does x @ W.T.
    # Pre-transpose so the kernel does x @ w directly.
    w1_pt = jax.random.uniform(k1, (d_model, d_model), jnp.float32, -bound, bound)
    b1 = jax.random.uniform(k2, (d_model,), jnp.float32, -bound, bound)
    w2_pt = jax.random.uniform(k3, (d_model, d_model), jnp.float32, -bound, bound)
    b2 = jax.random.uniform(k4, (d_model,), jnp.float32, -bound, bound)
    return (w1_pt.T, b1.reshape(1, d_model), w2_pt.T, b2.reshape(1, d_model))


if __name__ == "__main__":
    key = jax.random.PRNGKey(0)
    kx, kp = jax.random.split(key)

    batch, seq, d_model = 2, 8, 32
    x = jax.random.normal(kx, (batch, seq, d_model), dtype=jnp.float32)
    w1, b1, w2, b2 = init_ffn_params(kp, d_model)

    # Pure-JAX reference (same math, dropout = identity / eval mode).
    ref = jnp.maximum(x @ w1 + b1[0], 0.0) @ w2 + b2[0]

    # f32-operand path: tight check.
    out = jax.block_until_ready(ffn_forward(x, w1, b1, w2, b2))
    assert out.shape == (batch, seq, d_model)
    assert jnp.allclose(out, ref, atol=1e-5, rtol=1e-5)

    # bf16-operand path (MXU-friendly on v6e/v7x), f32 accumulation: loose check.
    out_bf16 = jax.block_until_ready(
        ffn_forward(x, w1, b1, w2, b2, compute_dtype=jnp.bfloat16))
    assert out_bf16.shape == (batch, seq, d_model)
    assert jnp.allclose(out_bf16, ref, atol=1e-1, rtol=1e-1)

    print("KERNEL_OK")
</pallas_src>

<mosaic_0001>
module attributes {stable_mosaic.version = 11 : i64} {
  func.func @ffn_kernel(%arg0: i32, %arg1: memref<16x128xf32, #tpu.memory_space<vmem>>, %arg2: memref<128x128xf32, #tpu.memory_space<vmem>>, %arg3: memref<1x128xf32, #tpu.memory_space<vmem>>, %arg4: memref<128x128xf32, #tpu.memory_space<vmem>>, %arg5: memref<1x128xf32, #tpu.memory_space<vmem>>, %arg6: memref<16x128xf32, #tpu.memory_space<vmem>>, %arg7: memref<16x128xf32, #tpu.memory_space<vmem>>) attributes {dimension_semantics = [#tpu.dimension_semantics<parallel>], iteration_bounds = array<i64: 1>, scalar_prefetch = 0 : i64, scratch_operands = 1 : i64, tpu.core_type = #tpu.core_type<tc>, window_params = [{transform_indices = @transform_0, window_bounds = array<i64: 16, 128>}, {pipeline_mode = #tpu.pipeline_mode<synchronous>, transform_indices = @transform_1, window_bounds = array<i64: 128, 128>}, {pipeline_mode = #tpu.pipeline_mode<synchronous>, transform_indices = @transform_2, window_bounds = array<i64: 1, 128>}, {pipeline_mode = #tpu.pipeline_mode<synchronous>, transform_indices = @transform_3, window_bounds = array<i64: 128, 128>}, {pipeline_mode = #tpu.pipeline_mode<synchronous>, transform_indices = @transform_4, window_bounds = array<i64: 1, 128>}, {transform_indices = @transform_5, window_bounds = array<i64: 16, 128>}]} {
    %c0 = arith.constant 0 : index
    %c0_0 = arith.constant 0 : index
    %0 = vector.load %arg1[%c0, %c0_0] : memref<16x128xf32, #tpu.memory_space<vmem>>, vector<16x128xf32>
    %c0_1 = arith.constant 0 : index
    %c0_2 = arith.constant 0 : index
    %1 = vector.load %arg2[%c0_1, %c0_2] : memref<128x128xf32, #tpu.memory_space<vmem>>, vector<128x128xf32>
    %cst = arith.constant dense<0.000000e+00> : vector<16x128xf32>
    %2 = tpu.matmul %0, %1, %cst {dimension_numbers = #tpu.dot_dimension_numbers<[1], [0], [0], [1], [0, 0, 1, 1], [], []>} : vector<16x128xf32>, vector<128x128xf32>, vector<16x128xf32> -> vector<16x128xf32>
    %c0_3 = arith.constant 0 : index
    %c0_4 = arith.constant 0 : index
    %3 = vector.load %arg3[%c0_3, %c0_4] : memref<1x128xf32, #tpu.memory_space<vmem>>, vector<1x128xf32>
    %4 = vector.broadcast %3 : vector<1x128xf32> to vector<16x128xf32>
    %5 = arith.addf %2, %4 : vector<16x128xf32>
    %cst_5 = arith.constant 0.000000e+00 : f32
    %6 = vector.broadcast %cst_5 : f32 to vector<16x128xf32>
    %7 = arith.maximumf %5, %6 : vector<16x128xf32>
    %c0_6 = arith.constant 0 : index
    %c0_7 = arith.constant 0 : index
    %8 = vector.load %arg7[%c0_6, %c0_7] : memref<16x128xf32, #tpu.memory_space<vmem>>, vector<16x128xf32>
    tpu.vector_store %arg7[%c0_6, %c0_7], %7 {strides = array<i32>} : memref<16x128xf32, #tpu.memory_space<vmem>>, vector<16x128xf32>,
    %c0_8 = arith.constant 0 : index
    %c0_9 = arith.constant 0 : index
    %9 = vector.load %arg7[%c0_8, %c0_9] : memref<16x128xf32, #tpu.memory_space<vmem>>, vector<16x128xf32>
    %c0_10 = arith.constant 0 : index
    %c0_11 = arith.constant 0 : index
    %10 = vector.load %arg4[%c0_10, %c0_11] : memref<128x128xf32, #tpu.memory_space<vmem>>, vector<128x128xf32>
    %cst_12 = arith.constant dense<0.000000e+00> : vector<16x128xf32>
    %11 = tpu.matmul %9, %10, %cst_12 {dimension_numbers = #tpu.dot_dimension_numbers<[1], [0], [0], [1], [0, 0, 1, 1], [], []>} : vector<16x128xf32>, vector<128x128xf32>, vector<16x128xf32> -> vector<16x128xf32>
    %c0_13 = arith.constant 0 : index
    %c0_14 = arith.constant 0 : index
    %12 = vector.load %arg5[%c0_13, %c0_14] : memref<1x128xf32, #tpu.memory_space<vmem>>, vector<1x128xf32>
    %13 = vector.broadcast %12 : vector<1x128xf32> to vector<16x128xf32>
    %14 = arith.addf %11, %13 : vector<16x128xf32>
    %c0_15 = arith.constant 0 : index
    %c0_16 = arith.constant 0 : index
    %15 = vector.load %arg6[%c0_15, %c0_16] : memref<16x128xf32, #tpu.memory_space<vmem>>, vector<16x128xf32>
    tpu.vector_store %arg6[%c0_15, %c0_16], %14 {strides = array<i32>} : memref<16x128xf32, #tpu.memory_space<vmem>>, vector<16x128xf32>,
    return
  }
  func.func @transform_0(%arg0: i32) -> (i32, i32) {
    %c0_i32 = arith.constant 0 : i32
    %c0_i32_0 = arith.constant 0 : i32
    return %arg0, %c0_i32 : i32, i32
  }
  func.func @transform_1(%arg0: i32) -> (i32, i32) {
    %c0_i32 = arith.constant 0 : i32
    %c0_i32_0 = arith.constant 0 : i32
    %c0_i32_1 = arith.constant 0 : i32
    return %c0_i32, %c0_i32_0 : i32, i32
  }
  func.func @transform_2(%arg0: i32) -> (i32, i32) {
    %c0_i32 = arith.constant 0 : i32
    %c0_i32_0 = arith.constant 0 : i32
    %c0_i32_1 = arith.constant 0 : i32
    return %c0_i32, %c0_i32_0 : i32, i32
  }
  func.func @transform_3(%arg0: i32) -> (i32, i32) {
    %c0_i32 = arith.constant 0 : i32
    %c0_i32_0 = arith.constant 0 : i32
    %c0_i32_1 = arith.constant 0 : i32
    return %c0_i32, %c0_i32_0 : i32, i32
  }
  func.func @transform_4(%arg0: i32) -> (i32, i32) {
    %c0_i32 = arith.constant 0 : i32
    %c0_i32_0 = arith.constant 0 : i32
    %c0_i32_1 = arith.constant 0 : i32
    return %c0_i32, %c0_i32_0 : i32, i32
  }
  func.func @transform_5(%arg0: i32) -> (i32, i32) {
    %c0_i32 = arith.constant 0 : i32
    %c0_i32_0 = arith.constant 0 : i32
    return %arg0, %c0_i32 : i32, i32
  }
}

</mosaic_0001>

<bundles_post_ra>
// kernel: ffn_forward.1
= control target key start
LH: loop header
LB: loop body
LE: loop exit
PB: predicated region body
PF: predicated region fallthrough
CT: control target
= control target key end

     0   :  { %s482_s1 = inlined_call_operand.vmem [shape: f32[128,128], index: 1, kind: input, shape index: {}]   ;;  %s483_s0 = inlined_call_operand.vmem [shape: f32[16,128], index: 0, kind: input, shape index: {}]   ;;  %s484_s3 = inlined_call_operand.vmem [shape: f32[128,128], index: 3, kind: input, shape index: {}]   ;;  %s485_s2 = inlined_call_operand.vmem [shape: f32[1,128], index: 2, kind: input, shape index: {}]   ;;  %s486_s4 = inlined_call_operand.vmem [shape: f32[1,128], index: 4, kind: input, shape index: {}]   ;;  %s487_s5 = inlined_call_operand.vmem [shape: f32[16,128], index: 5, kind: output, shape index: {}]  }
   0x1   :  { %v37_v0 = vld [vmem:[%s482_s1 + $0x78] sm:$0xff]  ;;  %v36_v1 = vld [vmem:[%s482_s1 + $0x70] sm:$0xff]  ;;  %v35_v2 = vld [vmem:[%s482_s1 + $0x68] sm:$0xff] }
   0x2   :  { %268 = vmatprep.subr.mxu0 %v37_v0  ;;  %v34_v3 = vld [vmem:[%s482_s1 + $0x60] sm:$0xff]  ;;  %v33_v5 = vld [vmem:[%s482_s1 + $0x58] sm:$0xff]  ;;  %v140_v7 = vld [vmem:[%s484_s3 + $0x70] sm:$0xff] }
   0x3   :  { %269 = vmatpush3.msra.mxu0 %v37_v0  ;;  %v20_v4 = vld [vmem:[%s483_s0] sm:$0xff]  ;;  %v141_v6 = vld [vmem:[%s484_s3 + $0x78] sm:$0xff]  ;;  %v32_v8 = vld [vmem:[%s482_s1 + $0x50] sm:$0xff] }
   0x4   :  { %270 = vmatprep.subr.mxu0 %v36_v1  ;;  %300 = vmatprep.mubr.f32.mxu0 %v20_v4  ;;  %v139_v9 = vld [vmem:[%s484_s3 + $0x68] sm:$0xff]  ;;  %v138_v11 = vld [vmem:[%s484_s3 + $0x60] sm:$0xff]  ;;  %v137_v13 = vld [vmem:[%s484_s3 + $0x58] sm:$0xff] }
   0x5   :  { %271 = vmatpush3.msra.mxu0 %v36_v1  ;;  %303 = vmatprep.subr.mxu1 %v141_v6  ;;  %v31_v10 = vld [vmem:[%s482_s1 + $0x48] sm:$0xff]  ;;  %v30_v12 = vld [vmem:[%s482_s1 + $0x40] sm:$0xff]  ;;  %v29_v14 = vld [vmem:[%s482_s1 + $0x38] sm:$0xff] }
   0x6   :  { %272 = vmatprep.subr.mxu0 %v35_v2  ;;  %304 = vmatpush3.msra.mxu1 %v141_v6  ;;  %v136_v15 = vld [vmem:[%s484_s3 + $0x50] sm:$0xff]  ;;  %v135_v17 = vld [vmem:[%s484_s3 + $0x48] sm:$0xff]  ;;  %v134_v19 = vld [vmem:[%s484_s3 + $0x40] sm:$0xff] }
   0x7   :  { %273 = vmatpush3.msra.mxu0 %v35_v2  ;;  %305 = vmatprep.subr.mxu1 %v140_v7  ;;  %v28_v16 = vld [vmem:[%s482_s1 + $0x30] sm:$0xff]  ;;  %v27_v18 = vld [vmem:[%s482_s1 + $0x28] sm:$0xff]  ;;  %v26_v20 = vld [vmem:[%s482_s1 + $0x20] sm:$0xff] }
   0x8   :  { %274 = vmatprep.subr.mxu0 %v34_v3  ;;  %306 = vmatpush3.msra.mxu1 %v140_v7  ;;  %v133_v21 = vld [vmem:[%s484_s3 + $0x38] sm:$0xff]  ;;  %v132_v23 = vld [vmem:[%s484_s3 + $0x30] sm:$0xff]  ;;  %v131_v25 = vld [vmem:[%s484_s3 + $0x28] sm:$0xff] }
   0x9   :  { %275 = vmatpush3.msra.mxu0 %v34_v3  ;;  %307 = vmatprep.subr.mxu1 %v139_v9  ;;  %v25_v22 = vld [vmem:[%s482_s1 + $0x18] sm:$0xff]  ;;  %v24_v24 = vld [vmem:[%s482_s1 + $0x10] sm:$0xff]  ;;  %v23_v26 = vld [vmem:[%s482_s1 + $0x8] sm:$0xff] }
   0xa   :  { %276 = vmatprep.subr.mxu0 %v33_v5  ;;  %308 = vmatpush3.msra.mxu1 %v139_v9  ;;  %v130_v27 = vld [vmem:[%s484_s3 + $0x20] sm:$0xff]  ;;  %v21_v29 = vld [vmem:[%s483_s0 + $0x8] sm:$0xff]  ;;  %v129_v30 = vld [vmem:[%s484_s3 + $0x18] sm:$0xff] }
   0xb   :  { %277 = vmatpush3.msra.mxu0 %v33_v5  ;;  %309 = vmatprep.subr.mxu1 %v138_v11  ;;  %v22_v28 = vld [vmem:[%s482_s1] sm:$0xff]  ;;  %v128_v31 = vld [vmem:[%s484_s3 + $0x10] sm:$0xff]  ;;  %v127_v32 = vld [vmem:[%s484_s3 + $0x8] sm:$0xff] }
   0xc   :  { %278 = vmatprep.subr.mxu0 %v32_v8  ;;  %310 = vmatpush3.msra.mxu1 %v138_v11  ;;  %v126_v33 = vld [vmem:[%s484_s3] sm:$0xff] }
   0xd   :  { %279 = vmatpush3.msra.mxu0 %v32_v8  ;;  %311 = vmatprep.subr.mxu1 %v137_v13  ;;  %v230_v34 = vld [vmem:[%s485_s2] ss:$0 sm:$0xff] }
   0xe   :  { %280 = vmatprep.subr.mxu0 %v31_v10  ;;  %312 = vmatpush3.msra.mxu1 %v137_v13  ;;  %v231_v41 = vld [vmem:[%s486_s4] ss:$0 sm:$0xff] }
   0xf   :  { %281 = vmatpush3.msra.mxu0 %v31_v10  ;;  %313 = vmatprep.subr.mxu1 %v136_v15 }
  0x10   :  { %282 = vmatprep.subr.mxu0 %v30_v12  ;;  %314 = vmatpush3.msra.mxu1 %v136_v15 }
  0x11   :  { %283 = vmatpush3.msra.mxu0 %v30_v12  ;;  %315 = vmatprep.subr.mxu1 %v135_v17 }
  0x12   :  { %284 = vmatprep.subr.mxu0 %v29_v14  ;;  %316 = vmatpush3.msra.mxu1 %v135_v17 }
  0x13   :  { %285 = vmatpush3.msra.mxu0 %v29_v14  ;;  %317 = vmatprep.subr.mxu1 %v134_v19 }
  0x14   :  { %286 = vmatprep.subr.mxu0 %v28_v16  ;;  %318 = vmatpush3.msra.mxu1 %v134_v19 }
  0x15   :  { %287 = vmatpush3.msra.mxu0 %v28_v16  ;;  %319 = vmatprep.subr.mxu1 %v133_v21 }
  0x16   :  { %288 = vmatprep.subr.mxu0 %v27_v18  ;;  %320 = vmatpush3.msra.mxu1 %v133_v21 }
  0x17   :  { %289 = vmatpush3.msra.mxu0 %v27_v18  ;;  %321 = vmatprep.subr.mxu1 %v132_v23 }
  0x18   :  { %290 = vmatprep.subr.mxu0 %v26_v20  ;;  %322 = vmatpush3.msra.mxu1 %v132_v23 }
  0x19   :  { %291 = vmatpush3.msra.mxu0 %v26_v20  ;;  %323 = vmatprep.subr.mxu1 %v131_v25 }
  0x1a   :  { %292 = vmatprep.subr.mxu0 %v25_v22  ;;  %324 = vmatpush3.msra.mxu1 %v131_v25 }
  0x1b   :  { %293 = vmatpush3.msra.mxu0 %v25_v22  ;;  %325 = vmatprep.subr.mxu1 %v130_v27 }
  0x1c   :  { %294 = vmatprep.subr.mxu0 %v24_v24  ;;  %326 = vmatpush3.msra.mxu1 %v130_v27 }
  0x1d   :  { %295 = vmatpush3.msra.mxu0 %v24_v24  ;;  %327 = vmatprep.subr.mxu1 %v129_v30 }
  0x1e   :  { %296 = vmatprep.subr.mxu0 %v23_v26  ;;  %328 = vmatpush3.msra.mxu1 %v129_v30 }
  0x1f   :  { %297 = vmatpush3.msra.mxu0 %v23_v26  ;;  %329 = vmatprep.subr.mxu1 %v128_v31 }
  0x20   :  { %298 = vmatprep.subr.mxu0 %v22_v28  ;;  %330 = vmatpush3.msra.mxu1 %v128_v31 }
  0x21   :  { %299 = vmatpush3.msra.mxu0 %v22_v28  ;;  %331 = vmatprep.subr.mxu1 %v127_v32 }
  0x22   :  { %301 = vmatmul.mubr.f32.vlgmr.msra.gmra.mxu0 %v21_v29  ;;  %332 = vmatpush3.msra.mxu1 %v127_v32 }
  0x23   :  { %333 = vmatprep.subr.mxu1 %v126_v33 }
  0x24   :  { %334 = vmatpush3.msra.mxu1 %v126_v33 }
  0xe2   :  { %v302_v35 = vpop.f32.mrf.mxu0 }
  0xe3   :  { %v117_v36 = vadd.f32 %v302_v35, %v230_v34 }
  0xe4   :  { %v111_v37 = vpop.f32.mrf.mxu0 }
  0xe5   :  { %v112_v38 = vadd.f32 %v230_v34, %v111_v37  ;;  %v121_v40 = vmax.f32 %v117_v36, 0.0 }
  0xe7   :  { %v120_v39 = vmax.f32 %v112_v38, 0.0 }
  0xe9   :  { %335 = vmatprep.mubr.f32.mxu1 %v120_v39 }
  0xea   :  { %336 = vmatmul.mubr.f32.vlgmr.msra.gmra.mxu1 %v121_v40 }
 0x1aa   :  { %v337_v42 = vpop.f32.mrf.mxu1 }
 0x1ab   :  { %v221_v43 = vadd.f32 %v337_v42, %v231_v41 }
 0x1ac   :  { %v215_v44 = vpop.f32.mrf.mxu1 }
 0x1ad   :  { %225 = vst [vmem:[%s487_s5 + $0x8] sm:$0xff] %v221_v43  ;;  %v216_v45 = vadd.f32 %v231_v41, %v215_v44 }
 0x1af   :  { %224 = vst [vmem:[%s487_s5] sm:$0xff] %v216_v45 }

</bundles_post_ra>
